<compile_context>
chip_gen: v7x
topology: tpu7x:2x2x1
jax: 0.10.0
libtpu: 0.0.40
codegen_flags: <defaults>
</compile_context>

<pallas_src>
import functools

import jax
import jax.numpy as jnp
from jax.experimental import pallas as pl
from jax.experimental.pallas import tpu as pltpu


BN_EPS = 1e-5
LANES = 128       # lane-padded feature width (keeps every store/matmul lane-dense)
N_LAYERS = 5
N_VEC_ROWS = 16   # rows 0..4 bias, 5..8 gamma, 9..12 beta, 13..15 zero padding


def mlp_kernel(x_ref, w_ref, v_ref, o_ref, *, inv_batch, k0):
    """Fused 5-layer MLP.

    x_ref : (batch, k0)                unpadded f32 input activations (k0 = n_feature,
                                       rounded up to a multiple of 16 by the wrapper)
    w_ref : (N_LAYERS*LANES, LANES)    layer-stacked, zero-padded (in, out) weights, bf16
    v_ref : (N_VEC_ROWS, LANES)        packed bias / gamma / beta rows, f32
    o_ref : (batch, LANES)             lane-dense output (cols >= n_output are exact 0)
    """
    vecs = v_ref[...]                    # tiny (16, 128) f32 slab, loaded once
    h = x_ref[...]                       # (batch, k0) f32

    for layer in range(N_LAYERS):
        row0 = layer * LANES
        k = k0 if layer == 0 else LANES
        w = w_ref[row0:row0 + k, :]                          # static slice, bf16
        b = vecs[layer:layer + 1, :]                         # (1, 128) f32
        # bf16 operands on the MXU, f32 accumulation.
        h = jnp.dot(h.astype(jnp.bfloat16), w,
                    preferred_element_type=jnp.float32) + b

        if layer < N_LAYERS - 1:
            h = jnp.maximum(h, 0.0)
            # Training-mode BN: batch mean & biased variance (one-pass form).
            mean = jnp.sum(h, axis=0, keepdims=True) * inv_batch
            ex2 = jnp.sum(h * h, axis=0, keepdims=True) * inv_batch
            var = jnp.maximum(ex2 - mean * mean, 0.0)        # clamp one-pass variance
            gamma = vecs[5 + layer:6 + layer, :]
            beta = vecs[9 + layer:10 + layer, :]
            scale = gamma * jax.lax.rsqrt(var + BN_EPS)      # rsqrt -> EUP slot
            shift = beta - mean * scale
            h = h * scale + shift                            # BN folded to one FMA/elem

    o_ref[...] = h


def pack_params(params):
    """Pack per-layer (w, b[, gamma, beta]) into a bf16 weight slab + f32 vector slab."""
    w_slab = jnp.zeros((N_LAYERS * LANES, LANES), jnp.float32)
    v_slab = jnp.zeros((N_VEC_ROWS, LANES), jnp.float32)
    idx = 0
    for layer in range(N_LAYERS):
        w, b = params[idx], params[idx + 1]
        idx += 2
        fan_in, fan_out = w.shape
        w_slab = w_slab.at[layer * LANES:layer * LANES + fan_in, :fan_out].set(w)
        v_slab = v_slab.at[layer, :fan_out].set(b.reshape(-1))
        if layer < N_LAYERS - 1:
            gamma, beta = params[idx], params[idx + 1]
            idx += 2
            v_slab = v_slab.at[5 + layer, :fan_out].set(gamma.reshape(-1))
            v_slab = v_slab.at[9 + layer, :fan_out].set(beta.reshape(-1))
    # bf16 weights for single-pass MXU matmuls; bias/gamma/beta stay f32.
    return w_slab.astype(jnp.bfloat16), v_slab


@jax.jit
def mlp_forward(x, w_slab, v_slab):
    """x: (batch, n_feature) f32.  Returns the lane-dense (batch, 128) output slab.

    Columns >= n_output are exact zeros; the consumer slices [:, :n_output]
    (kept out of this function to avoid an extra HBM pass per call).
    """
    batch, n_feat = x.shape
    # Keep the first-layer K dimension 16-aligned (bf16 sublane tile). For the
    # common case (n_feature % 16 == 0, e.g. 32) this emits no pad op at all.
    k0 = max(16, -(-n_feat // 16) * 16)
    if k0 != n_feat:
        x = jnp.pad(x, ((0, 0), (0, k0 - n_feat)))

    kernel = functools.partial(mlp_kernel, inv_batch=1.0 / batch, k0=k0)

    # Advisory cost estimate (matmul-dominated) for XLA's scheduler.
    flops = 2 * batch * LANES * (k0 + (N_LAYERS - 1) * LANES)
    bytes_accessed = (batch * k0 * 4                      # x
                      + N_LAYERS * LANES * LANES * 2      # bf16 weight slab
                      + N_VEC_ROWS * LANES * 4            # vector slab
                      + batch * LANES * 4)                # output slab
    cost = pl.CostEstimate(flops=flops,
                           transcendentals=(N_LAYERS - 1) * LANES,
                           bytes_accessed=bytes_accessed)

    # Whole-batch-resident design: VMEM footprint ~ batch * 1 KiB (+ ~0.2 MiB of
    # params).  32 MiB limit keeps plenty of headroom on v5e/v6e/v7x for the
    # sizes this kernel targets; for very large batch (esp. on v7x with 64 MiB
    # physical VMEM) switch to a batch-blocked grid with a two-pass BN instead.
    out = pl.pallas_call(
        kernel,
        out_shape=jax.ShapeDtypeStruct((batch, LANES), jnp.float32),
        in_specs=[pl.BlockSpec(memory_space=pltpu.MemorySpace.VMEM)] * 3,
        out_specs=pl.BlockSpec(memory_space=pltpu.MemorySpace.VMEM),
        compiler_params=pltpu.CompilerParams(vmem_limit_bytes=32 * 1024 * 1024),
        cost_estimate=cost,
    )(x, w_slab, v_slab)
    return out


def mlp_reference(x, params, matmul_dtype=jnp.float32):
    """Pure-JAX reference.  matmul_dtype=jnp.bfloat16 emulates the kernel's
    bf16-operand / f32-accumulate MXU numerics; float32 is the exact PyTorch math."""
    h = x
    idx = 0
    for layer in range(N_LAYERS):
        w, b = params[idx], params[idx + 1]
        idx += 2
        h = jnp.dot(h.astype(matmul_dtype), w.astype(matmul_dtype),
                    preferred_element_type=jnp.float32) + b
        if layer < N_LAYERS - 1:
            h = jnp.maximum(h, 0.0)
            mean = jnp.mean(h, axis=0, keepdims=True)
            var = jnp.mean((h - mean) ** 2, axis=0, keepdims=True)
            gamma, beta = params[idx], params[idx + 1]
            idx += 2
            h = (h - mean) * jax.lax.rsqrt(var + BN_EPS) * gamma + beta
    return h


def init_params(key, n_feature, n_hidden, n_output):
    """Deterministic synthetic parameters with the same shapes as the PyTorch module."""
    dims = [
        (n_feature, n_hidden),            # hidden_1
        (n_hidden, n_hidden // 2),        # hidden_2
        (n_hidden // 2, n_hidden // 4),   # hidden_3
        (n_hidden // 4, n_hidden // 8),   # hidden_4
        (n_hidden // 8, n_output),        # out
    ]
    params = []
    keys = jax.random.split(key, 2 * len(dims) + 2 * 4)
    ki = 0
    for layer_idx, (fan_in, fan_out) in enumerate(dims):
        scale = (2.0 / (fan_in + fan_out)) ** 0.5
        w = scale * jax.random.normal(keys[ki], (fan_in, fan_out), jnp.float32); ki += 1
        b = 0.1 * jax.random.normal(keys[ki], (1, fan_out), jnp.float32); ki += 1
        params.extend([w, b])
        if layer_idx < 4:  # BatchNorm1d after the first 4 layers
            gamma = 1.0 + 0.05 * jax.random.normal(keys[ki], (1, fan_out), jnp.float32); ki += 1
            beta = 0.05 * jax.random.normal(keys[ki], (1, fan_out), jnp.float32); ki += 1
            params.extend([gamma, beta])
    return tuple(params)


# TODO(synk): BatchNorm running_mean / running_var buffer updates are not produced
# (only the forward output is computed, matching forward()'s return value).
# Note: for large batch on v7x, add a leading batch grid axis
# (dimension_semantics=("parallel",)) with a cross-core BN reduction; at small
# batch the gridless, latency-bound design here is the right shape.

if __name__ == "__main__":
    batch = 8
    n_feature = 32
    n_hidden = 32
    n_output = 3

    key = jax.random.PRNGKey(0)
    k_x, k_p = jax.random.split(key)
    x = jax.random.normal(k_x, (batch, n_feature), jnp.float32)
    params = init_params(k_p, n_feature, n_hidden, n_output)

    w_slab, v_slab = pack_params(params)

    out_slab = mlp_forward(x, w_slab, v_slab)
    jax.block_until_ready(out_slab)

    assert out_slab.shape == (batch, LANES), out_slab.shape
    assert out_slab.dtype == jnp.float32
    # Padded output columns must be exact zeros (lane-dense store is exact).
    assert bool(jnp.all(out_slab[:, n_output:] == 0.0))

    out = out_slab[:, :n_output]   # consumer-side slice of the lane-dense slab

    # Numerics-matched reference (bf16 MXU operands, f32 accumulate): tight check.
    ref_bf16 = mlp_reference(x, params, matmul_dtype=jnp.bfloat16)
    assert jnp.allclose(out, ref_bf16, atol=1e-2, rtol=1e-2), (
        float(jnp.max(jnp.abs(out - ref_bf16))))

    # Full-f32 reference (exact PyTorch math): looser tolerance accounts for the
    # bf16 operand truncation in the 5-matmul chain.
    ref_f32 = mlp_reference(x, params, matmul_dtype=jnp.float32)
    assert jnp.allclose(out, ref_f32, atol=5e-2, rtol=5e-2), (
        float(jnp.max(jnp.abs(out - ref_f32))))

    print("KERNEL_OK")
</pallas_src>

<mosaic_0001>
module attributes {stable_mosaic.version = 11 : i64} {
  func.func @mlp_kernel(%arg0: memref<8x32xf32, #tpu.memory_space<vmem>>, %arg1: memref<640x128xbf16, #tpu.memory_space<vmem>>, %arg2: memref<16x128xf32, #tpu.memory_space<vmem>>, %arg3: memref<8x128xf32, #tpu.memory_space<vmem>>) attributes {dimension_semantics = [], scalar_prefetch = 0 : i64, scratch_operands = 0 : i64, tpu.core_type = #tpu.core_type<tc>} {
    %c0 = arith.constant 0 : index
    %c0_0 = arith.constant 0 : index
    %0 = vector.load %arg2[%c0, %c0_0] : memref<16x128xf32, #tpu.memory_space<vmem>>, vector<16x128xf32>
    %c0_1 = arith.constant 0 : index
    %c0_2 = arith.constant 0 : index
    %1 = vector.load %arg0[%c0_1, %c0_2] : memref<8x32xf32, #tpu.memory_space<vmem>>, vector<8x32xf32>
    %c0_3 = arith.constant 0 : index
    %c0_4 = arith.constant 0 : index
    %2 = vector.load %arg1[%c0_3, %c0_4] : memref<640x128xbf16, #tpu.memory_space<vmem>>, vector<32x128xbf16>
    %3 = vector.extract_strided_slice %0 {offsets = [0, 0], sizes = [1, 128], strides = [1, 1]} : vector<16x128xf32> to vector<1x128xf32>
    %4 = arith.truncf %1 : vector<8x32xf32> to vector<8x32xbf16>
    %cst = arith.constant dense<0.000000e+00> : vector<8x128xf32>
    %5 = tpu.matmul %4, %2, %cst {dimension_numbers = #tpu.dot_dimension_numbers<[1], [0], [0], [1], [0, 0, 1, 1], [], []>} : vector<8x32xbf16>, vector<32x128xbf16>, vector<8x128xf32> -> vector<8x128xf32>
    %6 = vector.broadcast %3 : vector<1x128xf32> to vector<8x128xf32>
    %7 = arith.addf %5, %6 : vector<8x128xf32>
    %cst_5 = arith.constant 0.000000e+00 : f32
    %8 = vector.broadcast %cst_5 : f32 to vector<8x128xf32>
    %9 = arith.maximumf %7, %8 : vector<8x128xf32>
    %cst_6 = arith.constant dense<0.000000e+00> : vector<128xf32>
    %10 = vector.multi_reduction <add>, %9, %cst_6 [0] : vector<8x128xf32> to vector<128xf32>
    %11 = vector.shape_cast %10 : vector<128xf32> to vector<1x128xf32>
    %cst_7 = arith.constant 1.250000e-01 : f32
    %12 = vector.broadcast %cst_7 : f32 to vector<1x128xf32>
    %13 = arith.mulf %11, %12 : vector<1x128xf32>
    %14 = arith.mulf %9, %9 : vector<8x128xf32>
    %cst_8 = arith.constant dense<0.000000e+00> : vector<128xf32>
    %15 = vector.multi_reduction <add>, %14, %cst_8 [0] : vector<8x128xf32> to vector<128xf32>
    %16 = vector.shape_cast %15 : vector<128xf32> to vector<1x128xf32>
    %cst_9 = arith.constant 1.250000e-01 : f32
    %17 = vector.broadcast %cst_9 : f32 to vector<1x128xf32>
    %18 = arith.mulf %16, %17 : vector<1x128xf32>
    %19 = arith.mulf %13, %13 : vector<1x128xf32>
    %20 = arith.subf %18, %19 : vector<1x128xf32>
    %cst_10 = arith.constant 0.000000e+00 : f32
    %21 = vector.broadcast %cst_10 : f32 to vector<1x128xf32>
    %22 = arith.maximumf %20, %21 : vector<1x128xf32>
    %23 = vector.extract_strided_slice %0 {offsets = [5, 0], sizes = [1, 128], strides = [1, 1]} : vector<16x128xf32> to vector<1x128xf32>
    %24 = vector.extract_strided_slice %0 {offsets = [9, 0], sizes = [1, 128], strides = [1, 1]} : vector<16x128xf32> to vector<1x128xf32>
    %cst_11 = arith.constant 9.99999974E-6 : f32
    %25 = vector.broadcast %cst_11 : f32 to vector<1x128xf32>
    %26 = arith.addf %22, %25 : vector<1x128xf32>
    %27 = math.rsqrt %26 : vector<1x128xf32>
    %28 = arith.mulf %23, %27 : vector<1x128xf32>
    %29 = arith.mulf %13, %28 : vector<1x128xf32>
    %30 = arith.subf %24, %29 : vector<1x128xf32>
    %31 = vector.broadcast %28 : vector<1x128xf32> to vector<8x128xf32>
    %32 = arith.mulf %9, %31 : vector<8x128xf32>
    %33 = vector.broadcast %30 : vector<1x128xf32> to vector<8x128xf32>
    %34 = arith.addf %32, %33 : vector<8x128xf32>
    %c128 = arith.constant 128 : index
    %c0_12 = arith.constant 0 : index
    %35 = vector.load %arg1[%c128, %c0_12] : memref<640x128xbf16, #tpu.memory_space<vmem>>, vector<128x128xbf16>
    %36 = vector.extract_strided_slice %0 {offsets = [1, 0], sizes = [1, 128], strides = [1, 1]} : vector<16x128xf32> to vector<1x128xf32>
    %37 = arith.truncf %34 : vector<8x128xf32> to vector<8x128xbf16>
    %cst_13 = arith.constant dense<0.000000e+00> : vector<8x128xf32>
    %38 = tpu.matmul %37, %35, %cst_13 {dimension_numbers = #tpu.dot_dimension_numbers<[1], [0], [0], [1], [0, 0, 1, 1], [], []>} : vector<8x128xbf16>, vector<128x128xbf16>, vector<8x128xf32> -> vector<8x128xf32>
    %39 = vector.broadcast %36 : vector<1x128xf32> to vector<8x128xf32>
    %40 = arith.addf %38, %39 : vector<8x128xf32>
    %cst_14 = arith.constant 0.000000e+00 : f32
    %41 = vector.broadcast %cst_14 : f32 to vector<8x128xf32>
    %42 = arith.maximumf %40, %41 : vector<8x128xf32>
    %cst_15 = arith.constant dense<0.000000e+00> : vector<128xf32>
    %43 = vector.multi_reduction <add>, %42, %cst_15 [0] : vector<8x128xf32> to vector<128xf32>
    %44 = vector.shape_cast %43 : vector<128xf32> to vector<1x128xf32>
    %cst_16 = arith.constant 1.250000e-01 : f32
    %45 = vector.broadcast %cst_16 : f32 to vector<1x128xf32>
    %46 = arith.mulf %44, %45 : vector<1x128xf32>
    %47 = arith.mulf %42, %42 : vector<8x128xf32>
    %cst_17 = arith.constant dense<0.000000e+00> : vector<128xf32>
    %48 = vector.multi_reduction <add>, %47, %cst_17 [0] : vector<8x128xf32> to vector<128xf32>
    %49 = vector.shape_cast %48 : vector<128xf32> to vector<1x128xf32>
    %cst_18 = arith.constant 1.250000e-01 : f32
    %50 = vector.broadcast %cst_18 : f32 to vector<1x128xf32>
    %51 = arith.mulf %49, %50 : vector<1x128xf32>
    %52 = arith.mulf %46, %46 : vector<1x128xf32>
    %53 = arith.subf %51, %52 : vector<1x128xf32>
    %cst_19 = arith.constant 0.000000e+00 : f32
    %54 = vector.broadcast %cst_19 : f32 to vector<1x128xf32>
    %55 = arith.maximumf %53, %54 : vector<1x128xf32>
    %56 = vector.extract_strided_slice %0 {offsets = [6, 0], sizes = [1, 128], strides = [1, 1]} : vector<16x128xf32> to vector<1x128xf32>
    %57 = vector.extract_strided_slice %0 {offsets = [10, 0], sizes = [1, 128], strides = [1, 1]} : vector<16x128xf32> to vector<1x128xf32>
    %cst_20 = arith.constant 9.99999974E-6 : f32
    %58 = vector.broadcast %cst_20 : f32 to vector<1x128xf32>
    %59 = arith.addf %55, %58 : vector<1x128xf32>
    %60 = math.rsqrt %59 : vector<1x128xf32>
    %61 = arith.mulf %56, %60 : vector<1x128xf32>
    %62 = arith.mulf %46, %61 : vector<1x128xf32>
    %63 = arith.subf %57, %62 : vector<1x128xf32>
    %64 = vector.broadcast %61 : vector<1x128xf32> to vector<8x128xf32>
    %65 = arith.mulf %42, %64 : vector<8x128xf32>
    %66 = vector.broadcast %63 : vector<1x128xf32> to vector<8x128xf32>
    %67 = arith.addf %65, %66 : vector<8x128xf32>
    %c256 = arith.constant 256 : index
    %c0_21 = arith.constant 0 : index
    %68 = vector.load %arg1[%c256, %c0_21] : memref<640x128xbf16, #tpu.memory_space<vmem>>, vector<128x128xbf16>
    %69 = vector.extract_strided_slice %0 {offsets = [2, 0], sizes = [1, 128], strides = [1, 1]} : vector<16x128xf32> to vector<1x128xf32>
    %70 = arith.truncf %67 : vector<8x128xf32> to vector<8x128xbf16>
    %cst_22 = arith.constant dense<0.000000e+00> : vector<8x128xf32>
    %71 = tpu.matmul %70, %68, %cst_22 {dimension_numbers = #tpu.dot_dimension_numbers<[1], [0], [0], [1], [0, 0, 1, 1], [], []>} : vector<8x128xbf16>, vector<128x128xbf16>, vector<8x128xf32> -> vector<8x128xf32>
    %72 = vector.broadcast %69 : vector<1x128xf32> to vector<8x128xf32>
    %73 = arith.addf %71, %72 : vector<8x128xf32>
    %cst_23 = arith.constant 0.000000e+00 : f32
    %74 = vector.broadcast %cst_23 : f32 to vector<8x128xf32>
    %75 = arith.maximumf %73, %74 : vector<8x128xf32>
    %cst_24 = arith.constant dense<0.000000e+00> : vector<128xf32>
    %76 = vector.multi_reduction <add>, %75, %cst_24 [0] : vector<8x128xf32> to vector<128xf32>
    %77 = vector.shape_cast %76 : vector<128xf32> to vector<1x128xf32>
    %cst_25 = arith.constant 1.250000e-01 : f32
    %78 = vector.broadcast %cst_25 : f32 to vector<1x128xf32>
    %79 = arith.mulf %77, %78 : vector<1x128xf32>
    %80 = arith.mulf %75, %75 : vector<8x128xf32>
    %cst_26 = arith.constant dense<0.000000e+00> : vector<128xf32>
    %81 = vector.multi_reduction <add>, %80, %cst_26 [0] : vector<8x128xf32> to vector<128xf32>
    %82 = vector.shape_cast %81 : vector<128xf32> to vector<1x128xf32>
    %cst_27 = arith.constant 1.250000e-01 : f32
    %83 = vector.broadcast %cst_27 : f32 to vector<1x128xf32>
    %84 = arith.mulf %82, %83 : vector<1x128xf32>
    %85 = arith.mulf %79, %79 : vector<1x128xf32>
    %86 = arith.subf %84, %85 : vector<1x128xf32>
    %cst_28 = arith.constant 0.000000e+00 : f32
    %87 = vector.broadcast %cst_28 : f32 to vector<1x128xf32>
    %88 = arith.maximumf %86, %87 : vector<1x128xf32>
    %89 = vector.extract_strided_slice %0 {offsets = [7, 0], sizes = [1, 128], strides = [1, 1]} : vector<16x128xf32> to vector<1x128xf32>
    %90 = vector.extract_strided_slice %0 {offsets = [11, 0], sizes = [1, 128], strides = [1, 1]} : vector<16x128xf32> to vector<1x128xf32>
    %cst_29 = arith.constant 9.99999974E-6 : f32
    %91 = vector.broadcast %cst_29 : f32 to vector<1x128xf32>
    %92 = arith.addf %88, %91 : vector<1x128xf32>
    %93 = math.rsqrt %92 : vector<1x128xf32>
    %94 = arith.mulf %89, %93 : vector<1x128xf32>
    %95 = arith.mulf %79, %94 : vector<1x128xf32>
    %96 = arith.subf %90, %95 : vector<1x128xf32>
    %97 = vector.broadcast %94 : vector<1x128xf32> to vector<8x128xf32>
    %98 = arith.mulf %75, %97 : vector<8x128xf32>
    %99 = vector.broadcast %96 : vector<1x128xf32> to vector<8x128xf32>
    %100 = arith.addf %98, %99 : vector<8x128xf32>
    %c384 = arith.constant 384 : index
    %c0_30 = arith.constant 0 : index
    %101 = vector.load %arg1[%c384, %c0_30] : memref<640x128xbf16, #tpu.memory_space<vmem>>, vector<128x128xbf16>
    %102 = vector.extract_strided_slice %0 {offsets = [3, 0], sizes = [1, 128], strides = [1, 1]} : vector<16x128xf32> to vector<1x128xf32>
    %103 = arith.truncf %100 : vector<8x128xf32> to vector<8x128xbf16>
    %cst_31 = arith.constant dense<0.000000e+00> : vector<8x128xf32>
    %104 = tpu.matmul %103, %101, %cst_31 {dimension_numbers = #tpu.dot_dimension_numbers<[1], [0], [0], [1], [0, 0, 1, 1], [], []>} : vector<8x128xbf16>, vector<128x128xbf16>, vector<8x128xf32> -> vector<8x128xf32>
    %105 = vector.broadcast %102 : vector<1x128xf32> to vector<8x128xf32>
    %106 = arith.addf %104, %105 : vector<8x128xf32>
    %cst_32 = arith.constant 0.000000e+00 : f32
    %107 = vector.broadcast %cst_32 : f32 to vector<8x128xf32>
    %108 = arith.maximumf %106, %107 : vector<8x128xf32>
    %cst_33 = arith.constant dense<0.000000e+00> : vector<128xf32>
    %109 = vector.multi_reduction <add>, %108, %cst_33 [0] : vector<8x128xf32> to vector<128xf32>
    %110 = vector.shape_cast %109 : vector<128xf32> to vector<1x128xf32>
    %cst_34 = arith.constant 1.250000e-01 : f32
    %111 = vector.broadcast %cst_34 : f32 to vector<1x128xf32>
    %112 = arith.mulf %110, %111 : vector<1x128xf32>
    %113 = arith.mulf %108, %108 : vector<8x128xf32>
    %cst_35 = arith.constant dense<0.000000e+00> : vector<128xf32>
    %114 = vector.multi_reduction <add>, %113, %cst_35 [0] : vector<8x128xf32> to vector<128xf32>
    %115 = vector.shape_cast %114 : vector<128xf32> to vector<1x128xf32>
    %cst_36 = arith.constant 1.250000e-01 : f32
    %116 = vector.broadcast %cst_36 : f32 to vector<1x128xf32>
    %117 = arith.mulf %115, %116 : vector<1x128xf32>
    %118 = arith.mulf %112, %112 : vector<1x128xf32>
    %119 = arith.subf %117, %118 : vector<1x128xf32>
    %cst_37 = arith.constant 0.000000e+00 : f32
    %120 = vector.broadcast %cst_37 : f32 to vector<1x128xf32>
    %121 = arith.maximumf %119, %120 : vector<1x128xf32>
    %122 = vector.extract_strided_slice %0 {offsets = [8, 0], sizes = [1, 128], strides = [1, 1]} : vector<16x128xf32> to vector<1x128xf32>
    %123 = vector.extract_strided_slice %0 {offsets = [12, 0], sizes = [1, 128], strides = [1, 1]} : vector<16x128xf32> to vector<1x128xf32>
    %cst_38 = arith.constant 9.99999974E-6 : f32
    %124 = vector.broadcast %cst_38 : f32 to vector<1x128xf32>
    %125 = arith.addf %121, %124 : vector<1x128xf32>
    %126 = math.rsqrt %125 : vector<1x128xf32>
    %127 = arith.mulf %122, %126 : vector<1x128xf32>
    %128 = arith.mulf %112, %127 : vector<1x128xf32>
    %129 = arith.subf %123, %128 : vector<1x128xf32>
    %130 = vector.broadcast %127 : vector<1x128xf32> to vector<8x128xf32>
    %131 = arith.mulf %108, %130 : vector<8x128xf32>
    %132 = vector.broadcast %129 : vector<1x128xf32> to vector<8x128xf32>
    %133 = arith.addf %131, %132 : vector<8x128xf32>
    %c512 = arith.constant 512 : index
    %c0_39 = arith.constant 0 : index
    %134 = vector.load %arg1[%c512, %c0_39] : memref<640x128xbf16, #tpu.memory_space<vmem>>, vector<128x128xbf16>
    %135 = vector.extract_strided_slice %0 {offsets = [4, 0], sizes = [1, 128], strides = [1, 1]} : vector<16x128xf32> to vector<1x128xf32>
    %136 = arith.truncf %133 : vector<8x128xf32> to vector<8x128xbf16>
    %cst_40 = arith.constant dense<0.000000e+00> : vector<8x128xf32>
    %137 = tpu.matmul %136, %134, %cst_40 {dimension_numbers = #tpu.dot_dimension_numbers<[1], [0], [0], [1], [0, 0, 1, 1], [], []>} : vector<8x128xbf16>, vector<128x128xbf16>, vector<8x128xf32> -> vector<8x128xf32>
    %138 = vector.broadcast %135 : vector<1x128xf32> to vector<8x128xf32>
    %139 = arith.addf %137, %138 : vector<8x128xf32>
    %c0_41 = arith.constant 0 : index
    %c0_42 = arith.constant 0 : index
    %140 = vector.load %arg3[%c0_41, %c0_42] : memref<8x128xf32, #tpu.memory_space<vmem>>, vector<8x128xf32>
    tpu.vector_store %arg3[%c0_41, %c0_42], %139 {strides = array<i32>} : memref<8x128xf32, #tpu.memory_space<vmem>>, vector<8x128xf32>,
    return
  }
}

</mosaic_0001>

<bundles_post_ra>
// kernel: mlp_forward.1
= control target key start
LH: loop header
LB: loop body
LE: loop exit
PB: predicated region body
PF: predicated region fallthrough
CT: control target
= control target key end

     0   :  { %8 = vsyncpa [#allocation3], 0  ;;  %s1185_s0 = inlined_call_operand.hbm [shape: f32[8,32], index: 0, kind: input, shape index: {}]   ;;  %s1186_s1 = inlined_call_operand.hbm [shape: bf16[640,128], index: 1, kind: input, shape index: {}]   ;;  %s1187_s2 = inlined_call_operand.hbm [shape: f32[16,128], index: 2, kind: input, shape index: {}]   ;;  %s1188_s3 = inlined_call_operand.hbm [shape: f32[8,128], index: 3, kind: output, shape index: {}]  }
   0x1   :  { %9 = vsyncpa [#allocation6], 0 }
   0x2   :  { %10 = vsyncpa [#allocation4], 0  ;;  %s1032_s12 = smov [#allocation5]   ;;  %s938_s16 = scalar_lea.hbm %s1186_s1, 5120 }
   0x3   :  { %s26_s13 = sshll.u32 %s1032_s12, 4  ;;  %p939_p0 = scmp.ne.s32.totalorder %s1186_s1, %s938_s16  ;;  %s27_s13 = int_to_ptr.vmem [resolvable:$true] %s26_s13 }
   0x4   :  { %p942_p1 = scmp.lt.u32.totalorder %s938_s16, %s1186_s1 }
   0x6   :  { %p944_p2 = pnand %p942_p1, %p939_p0 }
   0x8   :  { %947 = shalt.err (!%p944_p2)
}
   0x9   :  { %s948_s21 = scalar_lea.vmem %s27_s13, 5120  ;;  %p953_p4 = scmp.lt.s32.totalorder %s27_s13, %s27_s13 }
   0xa   :  { %p949_p3 = scmp.ne.s32.totalorder %s27_s13, %s948_s21  ;;  %p954_p5 = scmp.lt.s32.totalorder %s948_s21, %s948_s21 }
   0xc   :  { %p955_p6 = por %p954_p5, %p953_p4 }
   0xe   :  { %p956_p7 = pnand %p955_p6, %p949_p3 }
  0x10   :  { %959 = shalt.err (!%p956_p7)
}
  0x11   :  { %s1033_s22 = smov 64   ;;  %s1034_s23 = smov 4  }
  0x12   :  { %32 = dma.hbm_to_vmem [thread:$0]  %s1186_s1, 5120, %s27_s13, [#allocation6], %s1033_s22, %s1033_s22, %s1034_s23  }
  0x13   :  { %s1035_s26 = smov [#allocation2]   ;;  %s1036_s28 = smov [#allocation7]  }
  0x14   :  { %s17_s27 = sshll.u32 %s1035_s26, 4  ;;  %s38_s29 = sshll.u32 %s1036_s28, 4  ;;  %s18_s27 = int_to_ptr.vmem [resolvable:$true] %s17_s27  ;;  %s39_s29 = int_to_ptr.vmem [resolvable:$true] %s38_s29 }
  0x15   :  { %s960_s5 = scalar_lea.hbm %s1185_s0, 128 }
  0x16   :  { %p961_p8 = scmp.ne.s32.totalorder %s1185_s0, %s960_s5  ;;  %p964_p9 = scmp.lt.u32.totalorder %s960_s5, %s1185_s0 }
  0x18   :  { %p966_p10 = pnand %p964_p9, %p961_p8 }
  0x1a   :  { %969 = shalt.err (!%p966_p10)
}
  0x1b   :  { %s970_s1 = scalar_lea.vmem %s18_s27, 128  ;;  %p975_p12 = scmp.lt.s32.totalorder %s18_s27, %s18_s27 }
  0x1c   :  { %p971_p11 = scmp.ne.s32.totalorder %s18_s27, %s970_s1  ;;  %p976_p13 = scmp.lt.s32.totalorder %s970_s1, %s970_s1 }
  0x1e   :  { %p977_p0 = por %p976_p13, %p975_p12 }
  0x20   :  { %p978_p1 = pnand %p977_p0, %p971_p11 }
  0x22   :  { %981 = shalt.err (!%p978_p1)
}
  0x23   :  { %20 = dma.hbm_to_vmem [thread:$0]  %s1185_s0, 128, %s18_s27, [#allocation3]  }
  0x24   :  { %s982_s14 = scalar_lea.hbm %s1187_s2, 256 }
  0x25   :  { %p983_p2 = scmp.ne.s32.totalorder %s1187_s2, %s982_s14  ;;  %p986_p3 = scmp.lt.u32.totalorder %s982_s14, %s1187_s2 }
  0x27   :  { %p988_p4 = pnand %p986_p3, %p983_p2 }
  0x29   :  { %991 = shalt.err (!%p988_p4)
}
  0x2a   :  { %s992_s19 = scalar_lea.vmem %s39_s29, 256  ;;  %p997_p6 = scmp.lt.s32.totalorder %s39_s29, %s39_s29 }
  0x2b   :  { %p993_p5 = scmp.ne.s32.totalorder %s39_s29, %s992_s19  ;;  %p998_p7 = scmp.lt.s32.totalorder %s992_s19, %s992_s19 }
  0x2d   :  { %p999_p8 = por %p998_p7, %p997_p6 }
  0x2f   :  { %p1000_p9 = pnand %p999_p8, %p993_p5 }
  0x31   :  { %1003 = shalt.err (!%p1000_p9)
}
  0x32   :  { %s1037_s0 = smov 128   ;;  %s1038_s20 = smov 8  }
  0x33   :  { %44 = dma.hbm_to_vmem [thread:$0]  %s1187_s2, 256, %s39_s29, [#allocation6], %s1037_s0, %s1037_s0, %s1038_s20  }
  0x34   :  { %1026 = dma.done.wait [#allocation3], 128  }
  0x35   :  { %1027 = vsyncadd [#allocation3], 4294967168 }
  0x36   :  { %1028 = dma.done.wait [#allocation6], 5376  }
  0x37   :  { %1029 = vsyncadd [#allocation6], 4294961920  ;;  %v1039_v0 = vmov 0.0   ;;  %vm1040_vm0 = vmmov 0   ;;  %v896_v1 = vld [vmem:[#allocation5] sm:$0xff]   ;;  %v897_v2 = vld [vmem:[#allocation5 + $0x8] sm:$0xff]   ;;  %v63_v13 = vlaneseq }
  0x38   :  { %798 = vmatprep.subr.bf16.mxu0 %v1039_v0  ;;  %802 = vmatprep.mubr.msk.bf16.mxu0 %vm1040_vm0, %v1039_v0  ;;  %v57_v3 = vld [vmem:[#allocation2] sm:$0xff]  ;;  %vm79_vm1 = vcmask 261120   ;;  %v898_v5 = vld [vmem:[#allocation5 + $0x40] sm:$0xff]   ;;  %v899_v6 = vld [vmem:[#allocation5 + $0x48] sm:$0xff]   ;;  %s1041_s2 = smov [#allocation8]  }
  0x39   :  { %806 = vmatprep.subr.bf16.mxu1 %v1039_v0  ;;  %822 = vmatprep.mubr.msk.bf16.mxu1 %vm1040_vm0, %v1039_v0  ;;  %v62_v4 = vpack.c.bf16 %v57_v3, %v57_v3  ;;  %v900_v7 = vld [vmem:[#allocation5 + $0x50] sm:$0xff]   ;;  %v901_v8 = vld [vmem:[#allocation5 + $0x58] sm:$0xff]   ;;  %v902_v9 = vld [vmem:[#allocation5 + $0x60] sm:$0xff]   ;;  %v1116_v14 = vshrl.u32 %v63_v13, 7  ;;  %s714_s23 = sshll.u32 %s1041_s2, 4  ;;  %s715_s23 = int_to_ptr.vmem [resolvable:$true] %s714_s23 }
  0x3a   :  { %799 = vmatpush3.bf16.msra.mxu0 %v896_v1  ;;  %807 = vmatpush3.bf16.msra.mxu1 %v898_v5  ;;  %v903_v10 = vld [vmem:[#allocation5 + $0x68] sm:$0xff]   ;;  %v904_v11 = vld [vmem:[#allocation5 + $0x70] sm:$0xff]   ;;  %v905_v12 = vld [vmem:[#allocation5 + $0x78] sm:$0xff]   ;;  %s1004_s24 = scalar_lea.vmem %s715_s23, 128  ;;  %p1009_p11 = scmp.lt.s32.totalorder %s715_s23, %s715_s23 }
  0x3b   :  { %800 = vmatprep.subr.bf16.mxu0 %v1039_v0  ;;  %808 = vmatprep.subr.bf16.mxu1 %v1039_v0  ;;  %v65_v15 = vsub.s32 0, %v1116_v14  ;;  %v1119_v16 = vld [vmem:[#allocation7] sm:$0xff]  ;;  %v152_v45 = vsub.s32 5, %v1116_v14  ;;  %v1126_v47 = vld [vmem:[#allocation7 + $0x8] sm:$0xff]  ;;  %v157_v50 = vsub.s32 1, %v1116_v14  ;;  %v908_v58 = vld [vmem:[#allocation5 + $0x90] sm:$0xff]   ;;  %p1005_p10 = scmp.ne.s32.totalorder %s715_s23, %s1004_s24  ;;  %p1010_p12 = scmp.lt.s32.totalorder %s1004_s24, %s1004_s24 }
  0x3c   :  { %v906_v56 = vld [vmem:[#allocation5 + $0x80] sm:$0xff]   ;;  %v907_v57 = vld [vmem:[#allocation5 + $0x88] sm:$0xff]   ;;  %v909_v59 = vld [vmem:[#allocation5 + $0x98] sm:$0xff]  }
  0x3d   :  { %v66_v17 = vrot.slane %v1119_v16, %v65_v15  ;;  %v910_v60 = vld [vmem:[#allocation5 + $0xa0] sm:$0xff]   ;;  %v911_v61 = vld [vmem:[#allocation5 + $0xa8] sm:$0xff]   ;;  %v912_v62 = vld [vmem:[#allocation5 + $0xb0] sm:$0xff]   ;;  %v180_v1 = vrot.slane %v1119_v16, %v157_v50  ;;  %p1011_p13 = por %p1010_p12, %p1009_p11 }
  0x3e   :  { %801 = vmatpush3.bf16.msra.mxu0 %v897_v2  ;;  %809 = vmatpush3.bf16.msra.mxu1 %v899_v6  ;;  %v913_v63 = vld [vmem:[#allocation5 + $0xb8] sm:$0xff]  }
  0x3f   :  { %826 = vmatprep.subr.bf16.mxu0 %v1039_v0  ;;  %810 = vmatprep.subr.bf16.mxu1 %v1039_v0  ;;  %p1012_p0 = pnand %p1011_p13, %p1005_p10 }
  0x41   :  { %803 = vmatmul.mubr.msk.bf16.vlgmr.msra.gmra.mrb[0].mxu0 %vm79_vm1, %v62_v4 }
  0x42   :  { %842 = vmatprep.mubr.msk.bf16.mxu0 %vm1040_vm0, %v1039_v0  ;;  %811 = vmatpush3.bf16.msra.mxu1 %v900_v7 }
  0x43   :  { %812 = vmatprep.subr.bf16.mxu1 %v1039_v0  ;;  %827 = vmatpush3.bf16.msra.mxu0 %v906_v56 }
  0x44   :  { %828 = vmatprep.subr.bf16.mxu0 %v1039_v0 }
  0x46   :  { %813 = vmatpush3.bf16.msra.mxu1 %v901_v8 }
  0x47   :  { %814 = vmatprep.subr.bf16.mxu1 %v1039_v0  ;;  %829 = vmatpush3.bf16.msra.mxu0 %v907_v57 }
  0x48   :  { %830 = vmatprep.subr.bf16.mxu0 %v1039_v0 }
  0x4a   :  { %815 = vmatpush3.bf16.msra.mxu1 %v902_v9 }
  0x4b   :  { %816 = vmatprep.subr.bf16.mxu1 %v1039_v0  ;;  %831 = vmatpush3.bf16.msra.mxu0 %v908_v58 }
  0x4c   :  { %832 = vmatprep.subr.bf16.mxu0 %v1039_v0 }
  0x4e   :  { %817 = vmatpush3.bf16.msra.mxu1 %v903_v10 }
  0x4f   :  { %818 = vmatprep.subr.bf16.mxu1 %v1039_v0  ;;  %833 = vmatpush3.bf16.msra.mxu0 %v909_v59 }
  0x50   :  { %834 = vmatprep.subr.bf16.mxu0 %v1039_v0 }
  0x52   :  { %819 = vmatpush3.bf16.msra.mxu1 %v904_v11 }
  0x53   :  { %820 = vmatprep.subr.bf16.mxu1 %v1039_v0  ;;  %835 = vmatpush3.bf16.msra.mxu0 %v910_v60 }
  0x54   :  { %836 = vmatprep.subr.bf16.mxu0 %v1039_v0 }
  0x56   :  { %821 = vmatpush3.bf16.msra.mxu1 %v905_v12 }
  0x57   :  { %846 = vmatprep.subr.bf16.mxu1 %v1039_v0  ;;  %837 = vmatpush3.bf16.msra.mxu0 %v911_v61 }
  0x58   :  { %838 = vmatprep.subr.bf16.mxu0 %v1039_v0 }
  0x5b   :  { %839 = vmatpush3.bf16.msra.mxu0 %v912_v62 }
  0x5c   :  { %840 = vmatprep.subr.bf16.mxu0 %v1039_v0 }
  0x5f   :  { %841 = vmatpush3.bf16.msra.mxu0 %v913_v63 }
  0x60   :  { %866 = vmatprep.subr.bf16.mxu0 %v1039_v0 }
 0x114   :  { %v117_v18 = vpop.f32.mrb[0].mxu0 }
 0x115   :  { %v118_v19 = vadd.f32 %v117_v18, %v66_v17  ;;  %v804_v20 = vpop.f32.mrb[1].mxu0 }
 0x116   :  { %v120_v21 = vpop.f32.mrb[2].mxu0 }
 0x117   :  { %v123_v22 = vmax.f32 %v118_v19, 0.0  ;;  %v805_v23 = vpop.f32.mrb[3].mxu0 }
 0x119   :  { %v124_v24 = vrot.slane %v123_v22, 4  ;;  %v131_v25 = vmul.f32 %v123_v22, %v123_v22 }
 0x11b   :  { %v125_v26 = vadd.f32 %v124_v24, %v123_v22  ;;  %v132_v27 = vrot.slane %v131_v25, 4 }
 0x11d   :  { %v126_v28 = vrot.slane %v125_v26, 2  ;;  %v133_v29 = vadd.f32 %v132_v27, %v131_v25 }
 0x11f   :  { %v127_v30 = vadd.f32 %v126_v28, %v125_v26  ;;  %v134_v31 = vrot.slane %v133_v29, 2 }
 0x121   :  { %v128_v32 = vrot.slane %v127_v30, 1  ;;  %v135_v33 = vadd.f32 %v134_v31, %v133_v29 }
 0x123   :  { %v129_v34 = vadd.f32 %v128_v32, %v127_v30  ;;  %v136_v35 = vrot.slane %v135_v33, 1  ;;  %v298_v32 = vsub.s32 6, %v1116_v14 }
 0x125   :  { %v137_v36 = vadd.f32 %v136_v35, %v135_v33  ;;  %v130_v37 = vmul.f32 0.125, %v129_v34 }
 0x127   :  { %v138_v38 = vmul.f32 0.125, %v137_v36  ;;  %v139_v39 = vmul.f32 %v130_v37, %v130_v37  ;;  %v303_v36 = vsub.s32 2, %v1116_v14 }
 0x129   :  { %v140_v40 = vsub.f32 %v138_v38, %v139_v39 }
 0x12b   :  { %v141_v41 = vmax.f32 %v140_v40, 0.0 }
 0x12d   :  { %v142_v42 = vadd.f32 1e-05, %v141_v41 }
 0x12f   :  { %930 = vrsqrt.f32 %v142_v42  ;;  %v914_v42 = vld [vmem:[#allocation5 + $0xc0] sm:$0xff]  }
 0x139   :  { %v931_v43 = vpop.eup %930 }
 0x13a   :  { %v144_v44 = vmul.f32 %v931_v43, %v1119_v16  ;;  %v915_v43 = vld [vmem:[#allocation5 + $0xc8] sm:$0xff]  }
 0x13c   :  { %v145_v46 = vmul.f32 %v144_v44, %v130_v37  ;;  %v153_v49 = vrot.slane %v144_v44, %v152_v45  ;;  %v916_v44 = vld [vmem:[#allocation5 + $0xd0] sm:$0xff]   ;;  %v917_v45 = vld [vmem:[#allocation5 + $0xd8] sm:$0xff]  }
 0x13e   :  { %v147_v48 = vrot.slane %v145_v46, 4  ;;  %v154_v52 = vmul.f32 %v153_v49, %v123_v22  ;;  %v918_v46 = vld [vmem:[#allocation5 + $0xe0] sm:$0xff]   ;;  %v920_v49 = vld [vmem:[#allocation5 + $0xf0] sm:$0xff]  }
 0x140   :  { %v149_v51 = vsub.f32 %v1126_v47, %v147_v48  ;;  %v919_v48 = vld [vmem:[#allocation5 + $0xe8] sm:$0xff]  }
 0x142   :  { %v158_v53 = vrot.slane %v149_v51, %v157_v50  ;;  %v921_v50 = vld [vmem:[#allocation5 + $0xf8] sm:$0xff]   ;;  %v326_v51 = vrot.slane %v1119_v16, %v303_v36 }
 0x144   :  { %v159_v54 = vadd.f32 %v158_v53, %v154_v52 }
 0x146   :  { %v176_v55 = vpack.c.bf16 %v159_v54, %v159_v54 }
 0x148   :  { %823 = vmatmul.mubr.bf16.vlgmr.msra.gmra.mrb[0].mxu1 %v176_v55 }
 0x149   :  { %862 = vmatprep.mubr.msk.bf16.mxu1 %vm1040_vm0, %v1039_v0  ;;  %847 = vmatpush3.bf16.msra.mxu1 %v914_v42 }
 0x14a   :  { %848 = vmatprep.subr.bf16.mxu1 %v1039_v0 }
 0x14d   :  { %849 = vmatpush3.bf16.msra.mxu1 %v915_v43 }
 0x14e   :  { %850 = vmatprep.subr.bf16.mxu1 %v1039_v0 }
 0x151   :  { %851 = vmatpush3.bf16.msra.mxu1 %v916_v44 }
 0x152   :  { %852 = vmatprep.subr.bf16.mxu1 %v1039_v0 }
 0x155   :  { %853 = vmatpush3.bf16.msra.mxu1 %v917_v45 }
 0x156   :  { %854 = vmatprep.subr.bf16.mxu1 %v1039_v0 }
 0x159   :  { %855 = vmatpush3.bf16.msra.mxu1 %v918_v46 }
 0x15a   :  { %856 = vmatprep.subr.bf16.mxu1 %v1039_v0 }
 0x15d   :  { %857 = vmatpush3.bf16.msra.mxu1 %v919_v48 }
 0x15e   :  { %858 = vmatprep.subr.bf16.mxu1 %v1039_v0 }
 0x161   :  { %859 = vmatpush3.bf16.msra.mxu1 %v920_v49 }
 0x162   :  { %860 = vmatprep.subr.bf16.mxu1 %v1039_v0 }
 0x165   :  { %861 = vmatpush3.bf16.msra.mxu1 %v921_v50 }
 0x21b   :  { %v263_v2 = vpop.f32.mrb[0].mxu1 }
 0x21c   :  { %v264_v3 = vadd.f32 %v263_v2, %v180_v1  ;;  %v824_v4 = vpop.f32.mrb[1].mxu1 }
 0x21d   :  { %v266_v5 = vpop.f32.mrb[2].mxu1 }
 0x21e   :  { %v269_v6 = vmax.f32 %v264_v3, 0.0  ;;  %v825_v7 = vpop.f32.mrb[3].mxu1 }
 0x220   :  { %v270_v8 = vrot.slane %v269_v6, 4  ;;  %v277_v9 = vmul.f32 %v269_v6, %v269_v6 }
 0x222   :  { %v271_v10 = vadd.f32 %v270_v8, %v269_v6  ;;  %v278_v11 = vrot.slane %v277_v9, 4 }
 0x224   :  { %v272_v12 = vrot.slane %v271_v10, 2  ;;  %v279_v13 = vadd.f32 %v278_v11, %v277_v9 }
 0x226   :  { %v273_v17 = vadd.f32 %v272_v12, %v271_v10  ;;  %v280_v18 = vrot.slane %v279_v13, 2 }
 0x228   :  { %v274_v19 = vrot.slane %v273_v17, 1  ;;  %v281_v20 = vadd.f32 %v280_v18, %v279_v13 }
 0x22a   :  { %v275_v21 = vadd.f32 %v274_v19, %v273_v17  ;;  %v282_v22 = vrot.slane %v281_v20, 1  ;;  %v444_v19 = vsub.s32 7, %v1116_v14 }
 0x22c   :  { %v276_v23 = vmul.f32 0.125, %v275_v21  ;;  %v283_v24 = vadd.f32 %v282_v22, %v281_v20 }
 0x22e   :  { %v284_v25 = vmul.f32 0.125, %v283_v24  ;;  %v285_v26 = vmul.f32 %v276_v23, %v276_v23 }
 0x230   :  { %v286_v27 = vsub.f32 %v284_v25, %v285_v26 }
 0x232   :  { %v287_v28 = vmax.f32 %v286_v27, 0.0 }
 0x234   :  { %v288_v29 = vadd.f32 1e-05, %v287_v28 }
 0x236   :  { %932 = vrsqrt.f32 %v288_v29  ;;  %v922_v29 = vld [vmem:[#allocation5 + $0x100] sm:$0xff]  }
 0x240   :  { %v933_v30 = vpop.eup %932 }
 0x241   :  { %v290_v31 = vmul.f32 %v933_v30, %v1119_v16  ;;  %v923_v30 = vld [vmem:[#allocation5 + $0x108] sm:$0xff]  }
 0x243   :  { %v291_v33 = vmul.f32 %v290_v31, %v276_v23  ;;  %v299_v34 = vrot.slane %v290_v31, %v298_v32  ;;  %v449_v23 = vsub.s32 3, %v1116_v14  ;;  %v924_v31 = vld [vmem:[#allocation5 + $0x110] sm:$0xff]   ;;  %v925_v32 = vld [vmem:[#allocation5 + $0x118] sm:$0xff]  }
 0x245   :  { %v293_v35 = vrot.slane %v291_v33, 4  ;;  %v300_v38 = vmul.f32 %v299_v34, %v269_v6  ;;  %v926_v33 = vld [vmem:[#allocation5 + $0x120] sm:$0xff]   ;;  %v927_v34 = vld [vmem:[#allocation5 + $0x128] sm:$0xff]  }
 0x247   :  { %v295_v37 = vsub.f32 %v1126_v47, %v293_v35  ;;  %v928_v35 = vld [vmem:[#allocation5 + $0x130] sm:$0xff]  }
 0x249   :  { %v304_v39 = vrot.slane %v295_v37, %v303_v36  ;;  %v929_v36 = vld [vmem:[#allocation5 + $0x138] sm:$0xff]   ;;  %v472_v37 = vrot.slane %v1119_v16, %v449_v23 }
 0x24b   :  { %v305_v40 = vadd.f32 %v304_v39, %v300_v38 }
 0x24d   :  { %v322_v41 = vpack.c.bf16 %v305_v40, %v305_v40 }
 0x24f   :  { %843 = vmatmul.mubr.bf16.vlgmr.msra.gmra.mrb[4].mxu0 %v322_v41 }
 0x250   :  { %882 = vmatprep.mubr.msk.bf16.mxu0 %vm1040_vm0, %v1039_v0  ;;  %867 = vmatpush3.bf16.msra.mxu0 %v922_v29 }
 0x251   :  { %868 = vmatprep.subr.bf16.mxu0 %v1039_v0 }
 0x254   :  { %869 = vmatpush3.bf16.msra.mxu0 %v923_v30 }
 0x255   :  { %870 = vmatprep.subr.bf16.mxu0 %v1039_v0 }
 0x258   :  { %871 = vmatpush3.bf16.msra.mxu0 %v924_v31 }
 0x259   :  { %872 = vmatprep.subr.bf16.mxu0 %v1039_v0 }
 0x25c   :  { %873 = vmatpush3.bf16.msra.mxu0 %v925_v32 }
 0x25d   :  { %874 = vmatprep.subr.bf16.mxu0 %v1039_v0 }
 0x260   :  { %875 = vmatpush3.bf16.msra.mxu0 %v926_v33 }
 0x261   :  { %876 = vmatprep.subr.bf16.mxu0 %v1039_v0 }
 0x264   :  { %877 = vmatpush3.bf16.msra.mxu0 %v927_v34 }
 0x265   :  { %878 = vmatprep.subr.bf16.mxu0 %v1039_v0 }
 0x268   :  { %879 = vmatpush3.bf16.msra.mxu0 %v928_v35 }
 0x269   :  { %880 = vmatprep.subr.bf16.mxu0 %v1039_v0 }
 0x26c   :  { %881 = vmatpush3.bf16.msra.mxu0 %v929_v36 }
 0x322   :  { %v409_v52 = vpop.f32.mrb[4].mxu0 }
 0x323   :  { %v410_v53 = vadd.f32 %v409_v52, %v326_v51  ;;  %v844_v54 = vpop.f32.mrb[5].mxu0 }
 0x324   :  { %v412_v55 = vpop.f32.mrb[6].mxu0 }
 0x325   :  { %v415_v56 = vmax.f32 %v410_v53, 0.0  ;;  %v845_v57 = vpop.f32.mrb[7].mxu0 }
 0x327   :  { %v416_v58 = vrot.slane %v415_v56, 4  ;;  %v423_v59 = vmul.f32 %v415_v56, %v415_v56 }
 0x329   :  { %v417_v60 = vadd.f32 %v416_v58, %v415_v56  ;;  %v424_v61 = vrot.slane %v423_v59, 4 }
 0x32b   :  { %v418_v62 = vrot.slane %v417_v60, 2  ;;  %v425_v63 = vadd.f32 %v424_v61, %v423_v59 }
 0x32d   :  { %v419_v1 = vadd.f32 %v418_v62, %v417_v60  ;;  %v426_v2 = vrot.slane %v425_v63, 2 }
 0x32f   :  { %v420_v3 = vrot.slane %v419_v1, 1  ;;  %v427_v4 = vadd.f32 %v426_v2, %v425_v63 }
 0x331   :  { %v421_v5 = vadd.f32 %v420_v3, %v419_v1  ;;  %v428_v6 = vrot.slane %v427_v4, 1 }
 0x333   :  { %v422_v7 = vmul.f32 0.125, %v421_v5  ;;  %v429_v8 = vadd.f32 %v428_v6, %v427_v4  ;;  %v595_v5 = vsub.s32 4, %v1116_v14 }
 0x335   :  { %v430_v9 = vmul.f32 0.125, %v429_v8  ;;  %v431_v10 = vmul.f32 %v422_v7, %v422_v7 }
 0x337   :  { %v432_v11 = vsub.f32 %v430_v9, %v431_v10 }
 0x339   :  { %v433_v12 = vmax.f32 %v432_v11, 0.0  ;;  %v618_v11 = vrot.slane %v1119_v16, %v595_v5 }
 0x33b   :  { %v434_v13 = vadd.f32 1e-05, %v433_v12 }
 0x33d   :  { %934 = vrsqrt.f32 %v434_v13 }
 0x347   :  { %v935_v17 = vpop.eup %934 }
 0x348   :  { %v436_v18 = vmul.f32 %v935_v17, %v1119_v16 }
 0x34a   :  { %v437_v20 = vmul.f32 %v436_v18, %v422_v7  ;;  %v445_v21 = vrot.slane %v436_v18, %v444_v19 }
 0x34c   :  { %v439_v22 = vrot.slane %v437_v20, 4  ;;  %v446_v25 = vmul.f32 %v445_v21, %v415_v56 }
 0x34e   :  { %v441_v24 = vsub.f32 %v1126_v47, %v439_v22 }
 0x350   :  { %v450_v26 = vrot.slane %v441_v24, %v449_v23 }
 0x352   :  { %v451_v27 = vadd.f32 %v450_v26, %v446_v25 }
 0x354   :  { %v468_v28 = vpack.c.bf16 %v451_v27, %v451_v27 }
 0x356   :  { %863 = vmatmul.mubr.bf16.vlgmr.msra.gmra.mrb[4].mxu1 %v468_v28 }
 0x429   :  { %v555_v38 = vpop.f32.mrb[4].mxu1 }
 0x42a   :  { %v556_v39 = vadd.f32 %v555_v38, %v472_v37  ;;  %v864_v40 = vpop.f32.mrb[5].mxu1 }
 0x42b   :  { %v558_v41 = vpop.f32.mrb[6].mxu1 }
 0x42c   :  { %v561_v42 = vmax.f32 %v556_v39, 0.0  ;;  %v865_v43 = vpop.f32.mrb[7].mxu1 }
 0x42e   :  { %v562_v44 = vrot.slane %v561_v42, 4  ;;  %v569_v45 = vmul.f32 %v561_v42, %v561_v42 }
 0x430   :  { %v563_v46 = vadd.f32 %v562_v44, %v561_v42  ;;  %v570_v48 = vrot.slane %v569_v45, 4 }
 0x432   :  { %v564_v49 = vrot.slane %v563_v46, 2  ;;  %v571_v50 = vadd.f32 %v570_v48, %v569_v45 }
 0x434   :  { %v565_v51 = vadd.f32 %v564_v49, %v563_v46  ;;  %v572_v52 = vrot.slane %v571_v50, 2 }
 0x436   :  { %v566_v53 = vrot.slane %v565_v51, 1  ;;  %v573_v54 = vadd.f32 %v572_v52, %v571_v50 }
 0x438   :  { %v567_v0 = vadd.f32 %v566_v53, %v565_v51  ;;  %v574_v55 = vrot.slane %v573_v54, 1 }
 0x43a   :  { %v568_v56 = vmul.f32 0.125, %v567_v0  ;;  %v575_v57 = vadd.f32 %v574_v55, %v573_v54 }
 0x43c   :  { %v576_v58 = vmul.f32 0.125, %v575_v57  ;;  %v577_v59 = vmul.f32 %v568_v56, %v568_v56 }
 0x43e   :  { %v578_v60 = vsub.f32 %v576_v58, %v577_v59 }
 0x440   :  { %v579_v61 = vmax.f32 %v578_v60, 0.0 }
 0x442   :  { %v580_v62 = vadd.f32 1e-05, %v579_v61 }
 0x444   :  { %936 = vrsqrt.f32 %v580_v62 }
 0x44e   :  { %v937_v63 = vpop.eup %936 }
 0x44f   :  { %v582_v1 = vmul.f32 %v937_v63, %v1126_v47 }
 0x451   :  { %v583_v2 = vmul.f32 %v582_v1, %v568_v56  ;;  %v591_v3 = vrot.slane %v582_v1, %v65_v15 }
 0x453   :  { %v585_v4 = vrot.slane %v583_v2, 4  ;;  %v592_v7 = vmul.f32 %v591_v3, %v561_v42 }
 0x455   :  { %v587_v6 = vsub.f32 %v1126_v47, %v585_v4 }
 0x457   :  { %v596_v8 = vrot.slane %v587_v6, %v595_v5 }
 0x459   :  { %v597_v9 = vadd.f32 %v596_v8, %v592_v7 }
 0x45b   :  { %v614_v10 = vpack.c.bf16 %v597_v9, %v597_v9 }
 0x45d   :  { %883 = vmatmul.mubr.bf16.vlgmr.msra.gmra.mrb[8].mxu0 %v614_v10 }
 0x530   :  { %v701_v12 = vpop.f32.mrb[8].mxu0 }
 0x531   :  { %v702_v13 = vadd.f32 %v701_v12, %v618_v11  ;;  %v884_v17 = vpop.f32.mrb[9].mxu0 }
 0x532   :  { %v704_v18 = vpop.f32.mrb[10].mxu0 }
 0x533   :  { %707 = vst [vmem:[#allocation8] sm:$0xff] %v702_v13  ;;  %v885_v15 = vpop.f32.mrb[11].mxu0 }
 0x534   :  { %1015 = shalt.err (!%p1012_p0)
}
 0x535   :  { %s1016_s27 = scalar_lea.hbm %s1188_s3, 128 }
 0x536   :  { %p1017_p1 = scmp.ne.s32.totalorder %s1188_s3, %s1016_s27  ;;  %p1020_p2 = scmp.lt.u32.totalorder %s1016_s27, %s1188_s3 }
 0x538   :  { %p1022_p3 = pnand %p1020_p2, %p1017_p1 }
 0x53a   :  { %1025 = shalt.err (!%p1022_p3)
}
 0x53b   :  { %717 = dma.vmem_to_hbm [thread:$0]  %s715_s23, 128, %s1188_s3, [#allocation4]  }
 0x53c   :  { %1030 = dma.done.wait [#allocation4], 128  }
 0x53d   :  { %1031 = vsyncadd [#allocation4], 4294967168 }
 0x53e   :  { %721 = vsyncpa [#allocation3], 1 }
 0x53f   :  { %722 = vsyncpa [#allocation6], 1 }
 0x540   :  { %723 = vsyncpa [#allocation4], 1 }

</bundles_post_ra>
